<compile_context>
chip_gen: v7x
topology: tpu7x:2x2x1
jax: 0.10.0
libtpu: 0.0.40
codegen_flags: <defaults>
</compile_context>

<pallas_src>
import functools

import jax
import jax.numpy as jnp
from jax.experimental import pallas as pl
from jax.experimental.pallas import tpu as pltpu


def _round_up(v: int, m: int) -> int:
    return -(-v // m) * m


def _cdiv(a: int, b: int) -> int:
    return -(-a // b)


# Sublane multiple (second-minor padding) per itemsize.
_SUBLANE = {4: 8, 2: 16, 1: 32}


# ---------------------------------------------------------------------------
# Kernels
# ---------------------------------------------------------------------------
def _entropy_spatial_kernel(x_ref, o_ref, *, block_rows, block_cols, total_rows,
                            total_cols, mask_rows, mask_cols, out_lanes):
    # x_ref: (BN, C, TL) block of the (N, C, L) input.
    x = x_ref[...].astype(jnp.float32)                 # (BN, C, TL)

    # Numerically stable per-position entropy term (reduce over class axis=1):
    #   sum_c p*log p = sum_c(e*s)/z - log(z),  s = x - max, e = exp(s).
    m = jnp.max(x, axis=1, keepdims=True)              # (BN, 1, TL)
    s = x - m
    e = jnp.exp(s)
    z = jnp.sum(e, axis=1)                             # (BN, TL)
    es = jnp.sum(e * s, axis=1)                        # (BN, TL)
    ent = es / z - jnp.log(z)                          # (BN, TL)

    if mask_cols:
        col = (pl.program_id(1) * block_cols
               + jax.lax.broadcasted_iota(jnp.int32, ent.shape, 1))
        ent = jnp.where(col < total_cols, ent, 0.0)
    if mask_rows:
        row = (pl.program_id(0) * block_rows
               + jax.lax.broadcasted_iota(jnp.int32, ent.shape, 0))
        ent = jnp.where(row < total_rows, ent, 0.0)

    if out_lanes == block_cols:
        # Small lane tiles: lane-dense store, no cross-lane XLU reduce and no
        # masked single-element vst; the wrapper's jnp.sum finishes it.
        o_ref[...] = jnp.sum(ent, axis=0).reshape(1, 1, 1, out_lanes)
    else:
        # Multi-MiB tiles: the one cross-lane reduce + scalar store per step
        # is negligible next to the block DMA.
        o_ref[...] = jnp.sum(ent).reshape(1, 1, 1, 1)


def _entropy_logits_kernel(x_ref, o_ref, *, block_rows, total_rows, mask_rows):
    # x_ref: (BN, C) block of (N, C) logits; C lives on the lane axis.
    x = x_ref[...].astype(jnp.float32)                 # (BN, C)
    m = jnp.max(x, axis=1, keepdims=True)              # (BN, 1)
    s = x - m
    e = jnp.exp(s)
    z = jnp.sum(e, axis=1, keepdims=True)              # (BN, 1)
    es = jnp.sum(e * s, axis=1, keepdims=True)         # (BN, 1)
    ent = es / z - jnp.log(z)                          # (BN, 1)

    if mask_rows:
        row = (pl.program_id(0) * block_rows
               + jax.lax.broadcasted_iota(jnp.int32, ent.shape, 0))
        ent = jnp.where(row < total_rows, ent, 0.0)

    o_ref[...] = jnp.sum(ent).reshape(1, 1, 1, 1)


# ---------------------------------------------------------------------------
# Wrappers
# ---------------------------------------------------------------------------
def _entropy_loss_spatial(x3, n, c, l, itemsize, sub, target_bytes, tile_cols):
    c_pad_in = _round_up(c, sub)      # input-dtype sublane padding
    c_pad_f32 = _round_up(c, 8)       # f32 intermediates sublane padding

    # Lane tiling.
    if tile_cols is not None:
        tl = int(tile_cols)
    elif l <= 128:
        tl = l
    else:
        lane_budget = max(128, (target_bytes // (c_pad_in * itemsize)) // 128 * 128)
        tl = min(_round_up(l, 128), lane_budget)
        if n == 1 and _cdiv(l, tl) < 2:
            # v7x: make sure a single-image input still produces >= 2 parallel
            # grid blocks so both TensorCores get work.
            tl = max(128, _round_up(_cdiv(l, 2), 128))
    num_l_tiles = _cdiv(l, tl)
    lane_pad = _round_up(tl, 128)

    # Batch blocking (only when all of L fits in a single lane tile).
    row_bytes_in = c_pad_in * lane_pad * itemsize
    row_bytes_f32 = c_pad_f32 * lane_pad * 4
    if num_l_tiles == 1:
        rows_budget = max(1, target_bytes // row_bytes_in)
        bn = min(n, rows_budget)
        if n > 1 and bn >= n:
            bn = _cdiv(n, 2)          # keep >= 2 parallel blocks (v7x megacore)
    else:
        bn = 1
    num_n_blocks = _cdiv(n, bn)

    mask_cols = (l % tl) != 0
    mask_rows = (n % bn) != 0
    ow = tl if tl <= 128 else 1       # lane-dense partials for small tiles

    # VMEM budget: 2x double-buffered input block (padded) + ~3 full-tile f32
    # intermediates (x, s, e/e*s) + slack for the output block / internals.
    vmem_needed = 2 * bn * row_bytes_in + 3 * bn * row_bytes_f32 + (2 << 20)
    vmem_limit = int(min(max(vmem_needed, 32 << 20), 96 << 20))

    kernel = functools.partial(
        _entropy_spatial_kernel, block_rows=bn, block_cols=tl,
        total_rows=n, total_cols=l, mask_rows=mask_rows, mask_cols=mask_cols,
        out_lanes=ow)

    cost = pl.CostEstimate(
        flops=5 * n * c * l,
        transcendentals=n * l * (c + 1),
        bytes_accessed=n * c * l * itemsize + num_n_blocks * num_l_tiles * ow * 4)

    partials = pl.pallas_call(
        kernel,
        out_shape=jax.ShapeDtypeStruct((num_n_blocks, num_l_tiles, 1, ow),
                                       jnp.float32),
        grid=(num_n_blocks, num_l_tiles),
        in_specs=[pl.BlockSpec((bn, c, tl), lambda i, j: (i, 0, j))],
        out_specs=pl.BlockSpec((1, 1, 1, ow), lambda i, j: (i, j, 0, 0)),
        compiler_params=pltpu.CompilerParams(
            dimension_semantics=("parallel", "parallel"),
            vmem_limit_bytes=vmem_limit),
        cost_estimate=cost,
    )(x3)

    return -jnp.sum(partials) / jnp.float32(n * l)


def _entropy_loss_logits(x2, n, c, itemsize, sub, target_bytes):
    # (N, C) logits: C on lanes (dense vregs even for small C*L), many batch
    # rows per block to amortize the per-step overhead.
    del sub
    c_lane_pad = _round_up(c, 128)
    row_bytes_in = c_lane_pad * itemsize
    row_bytes_f32 = c_lane_pad * 4

    rows_budget = max(8, (target_bytes // row_bytes_in) // 8 * 8)
    bn = min(n, rows_budget)
    if bn < n:
        bn = max(8, (bn // 8) * 8)             # second-minor block dim 8-aligned
    elif n >= 16:
        bn = _round_up(_cdiv(n, 2), 8)         # >= 2 parallel blocks (v7x)
    num_blocks = _cdiv(n, bn)
    mask_rows = (n % bn) != 0

    vmem_needed = 2 * bn * row_bytes_in + 3 * bn * row_bytes_f32 + (2 << 20)
    vmem_limit = int(min(max(vmem_needed, 32 << 20), 96 << 20))

    kernel = functools.partial(
        _entropy_logits_kernel, block_rows=bn, total_rows=n, mask_rows=mask_rows)

    cost = pl.CostEstimate(
        flops=5 * n * c,
        transcendentals=n * (c + 1),
        bytes_accessed=n * c * itemsize + num_blocks * 4)

    partials = pl.pallas_call(
        kernel,
        out_shape=jax.ShapeDtypeStruct((num_blocks, 1, 1, 1), jnp.float32),
        grid=(num_blocks,),
        in_specs=[pl.BlockSpec((bn, c), lambda i: (i, 0))],
        out_specs=pl.BlockSpec((1, 1, 1, 1), lambda i: (i, 0, 0, 0)),
        compiler_params=pltpu.CompilerParams(
            dimension_semantics=("parallel",),
            vmem_limit_bytes=vmem_limit),
        cost_estimate=cost,
    )(x2)

    return -jnp.sum(partials) / jnp.float32(n)


def entropy_loss(x, *, tile_cols=None, target_block_bytes=4 << 20):
    """-mean over all non-class positions of sum_c softmax(x,1)*log_softmax(x,1)."""
    x = jnp.asarray(x)
    if x.ndim < 2:
        raise ValueError("EntropyLoss expects >= 2 dims (dim=1 is the class axis)")

    n = x.shape[0]
    c = x.shape[1]
    l = 1
    for d in x.shape[2:]:
        l *= d
    l = max(l, 1)

    itemsize = jnp.dtype(x.dtype).itemsize
    sub = _SUBLANE.get(itemsize, 8)

    if l == 1 and tile_cols is None:
        return _entropy_loss_logits(x.reshape(n, c), n, c, itemsize, sub,
                                    target_block_bytes)
    return _entropy_loss_spatial(x.reshape(n, c, l), n, c, l, itemsize, sub,
                                 target_block_bytes, tile_cols)


def entropy_loss_ref(x):
    # Pure-JAX reference matching the PyTorch module.
    p = jax.nn.softmax(x, axis=1)
    logp = jax.nn.log_softmax(x, axis=1)
    b = jnp.sum(p * logp, axis=1)
    return -1.0 * jnp.mean(b)


if __name__ == "__main__":
    def _check(x, **kw):
        got = jax.block_until_ready(entropy_loss(x, **kw))
        ref = entropy_loss_ref(x)
        assert jnp.allclose(got, ref, atol=1e-5, rtol=1e-5), (got, ref)

    # 1) NCHW segmentation-style input (class axis = dim 1).
    _check(jax.random.normal(jax.random.PRNGKey(0), (2, 4, 16, 16),
                             dtype=jnp.float32))

    # 2) Spatial size not a multiple of 128 -> masked lane overhang.
    _check(jax.random.normal(jax.random.PRNGKey(1), (2, 5, 9, 20),
                             dtype=jnp.float32))

    # 3) Single image, L > 128 -> auto-split into >= 2 lane tiles (megacore),
    #    plus a forced 128-lane multi-tile masked path.
    x3 = jax.random.normal(jax.random.PRNGKey(2), (1, 3, 24, 24),
                           dtype=jnp.float32)
    _check(x3)
    _check(x3, tile_cols=128)

    # 4) Tiny-L input -> batch-blocked spatial path (many rows per grid step).
    _check(jax.random.normal(jax.random.PRNGKey(3), (16, 4, 3),
                             dtype=jnp.float32))

    # 5) Plain (N, C) logits -> C-on-lanes path with row blocking + row mask.
    _check(jax.random.normal(jax.random.PRNGKey(4), (37, 10),
                             dtype=jnp.float32))

    print("KERNEL_OK")
</pallas_src>

<mosaic_0001>
module attributes {stable_mosaic.version = 11 : i64} {
  func.func @_entropy_spatial_kernel(%arg0: i32, %arg1: i32, %arg2: memref<1x4x256xf32, #tpu.memory_space<vmem>>, %arg3: memref<1x1x1x1xf32, #tpu.memory_space<vmem>>) attributes {dimension_semantics = [#tpu.dimension_semantics<parallel>, #tpu.dimension_semantics<parallel>], iteration_bounds = array<i64: 2, 1>, scalar_prefetch = 0 : i64, scratch_operands = 0 : i64, tpu.core_type = #tpu.core_type<tc>, window_params = [{transform_indices = @transform_0, window_bounds = array<i64: 1, 4, 256>}, {transform_indices = @transform_1, window_bounds = array<i64: 1, 1, 1, 1>}]} {
    %c0 = arith.constant 0 : index
    %c0_0 = arith.constant 0 : index
    %c0_1 = arith.constant 0 : index
    %0 = vector.load %arg2[%c0, %c0_0, %c0_1] : memref<1x4x256xf32, #tpu.memory_space<vmem>>, vector<1x4x256xf32>
    %cst = arith.constant dense<0xFF800000> : vector<1x256xf32>
    %1 = vector.multi_reduction <maximumf>, %0, %cst [1] : vector<1x4x256xf32> to vector<1x256xf32>
    %2 = vector.shape_cast %1 : vector<1x256xf32> to vector<1x1x256xf32>
    %3 = vector.broadcast %2 : vector<1x1x256xf32> to vector<1x4x256xf32>
    %4 = arith.subf %0, %3 : vector<1x4x256xf32>
    %5 = math.exp %4 : vector<1x4x256xf32>
    %cst_2 = arith.constant dense<0.000000e+00> : vector<1x256xf32>
    %6 = vector.multi_reduction <add>, %5, %cst_2 [1] : vector<1x4x256xf32> to vector<1x256xf32>
    %7 = arith.mulf %5, %4 : vector<1x4x256xf32>
    %cst_3 = arith.constant dense<0.000000e+00> : vector<1x256xf32>
    %8 = vector.multi_reduction <add>, %7, %cst_3 [1] : vector<1x4x256xf32> to vector<1x256xf32>
    %9 = arith.divf %8, %6 : vector<1x256xf32>
    %10 = math.log %6 : vector<1x256xf32>
    %11 = arith.subf %9, %10 : vector<1x256xf32>
    %12 = vector.shape_cast %11 : vector<1x256xf32> to vector<1x1x256xf32>
    %cst_4 = arith.constant dense<0.000000e+00> : vector<1xf32>
    %13 = vector.multi_reduction <add>, %12, %cst_4 [1, 2] : vector<1x1x256xf32> to vector<1xf32>
    %14 = vector.shape_cast %13 : vector<1xf32> to vector<1x1x1xf32>
    %15 = vector.extract %14[0, 0, 0] : f32 from vector<1x1x1xf32>
    %16 = vector.broadcast %15 : f32 to vector<1x1x1x1xf32>
    %c0_5 = arith.constant 0 : index
    %c0_6 = arith.constant 0 : index
    %c0_7 = arith.constant 0 : index
    %c0_8 = arith.constant 0 : index
    %17 = vector.load %arg3[%c0_5, %c0_6, %c0_7, %c0_8] : memref<1x1x1x1xf32, #tpu.memory_space<vmem>>, vector<1x1x1x1xf32>
    tpu.vector_store %arg3[%c0_5, %c0_6, %c0_7, %c0_8], %16 {strides = array<i32>} : memref<1x1x1x1xf32, #tpu.memory_space<vmem>>, vector<1x1x1x1xf32>,
    return
  }
  func.func @transform_0(%arg0: i32, %arg1: i32) -> (i32, i32, i32) {
    %c0_i32 = arith.constant 0 : i32
    %c0_i32_0 = arith.constant 0 : i32
    return %arg0, %c0_i32, %arg1 : i32, i32, i32
  }
  func.func @transform_1(%arg0: i32, %arg1: i32) -> (i32, i32, i32, i32) {
    %c0_i32 = arith.constant 0 : i32
    %c0_i32_0 = arith.constant 0 : i32
    %c0_i32_1 = arith.constant 0 : i32
    return %arg0, %arg1, %c0_i32, %c0_i32_0 : i32, i32, i32, i32
  }
}

</mosaic_0001>

<bundles_post_ra>
// kernel: tpu_custom_call.1
= control target key start
LH: loop header
LB: loop body
LE: loop exit
PB: predicated region body
PF: predicated region fallthrough
CT: control target
= control target key end

     0   :  { %6 = vsyncpa [#allocation3], 0  ;;  %s627_s0 = inlined_call_operand.hbm [shape: f32[2,4,256], index: 0, kind: input, shape index: {}]   ;;  %s628_s1 = inlined_call_operand.vmem [shape: f32[2,1,1,1], index: 1, kind: output, shape index: {}]  }
   0x1   :  { %8 = vsyncpa [#allocation3 + $0x1], 0  ;;  %s496_s6 = smov 0   ;;  %s498_s7 = smov 0  }
   0x2   :  { %s500_s8 = smov 0   ;;  %s502_s9 = smov 0  }
   0x3   :  { %s504_s10 = smov 0   ;;  %s506_s11 = smov 0  }
   0x4 LB: > { %s323_s12 = sadd.s32 4294967295, %s483_s11   ;;  %s26_s13 = sadd.s32 1, %s479_s10  ;;  %s483_s11 = sphi %s506_s11, %s14_s11   ;;  %s479_s10 = sphi %s504_s10, %s638_s10   ;;  %s475_s9 = sphi %s502_s9, %s637_s9   ;;  %s471_s8 = sphi %s500_s8, %s636_s8   ;;  %s467_s7 = sphi %s498_s7, %s635_s7   ;;  %s463_s6 = sphi %s496_s6, %s634_s6  }
   0x5   : > { %p28_p0 = scmp.ge.s32.totalorder %s26_s13, 2  ;;  %s35_s14 = sadd.s32 1, %s471_s8 }
   0x6   : > { %p42_p1 = scmp.ne.s32.totalorder %s471_s8, %s467_s7  ;;  %p43_p2 = scmp.eq.s32.totalorder %s483_s11, 0 }
   0x7   : > { %s640_s13 = smov (%p28_p0, %s26_s13), 0  ;;  %p48_p4 = scmp.ne.s32.totalorder %s467_s7, %s463_s6 }
   0x8   : > { %p532_p3 = por %p43_p2, %p42_p1  ;;  %s30_s16 = ssub.s32 %s479_s10, %s640_s13 }
   0x9   : > { %p49_p5 = scmp.eq.s32.totalorder %s323_s12, 0  ;;  %p33_p6 = scmp.eq.s32.totalorder %s30_s16, 0 }
   0xa   : > { %p343_p8 = scmp.lt.s32.totalorder %s483_s11, 2  ;;  %s100_s19 = sand.u32 1, %s471_s8  }
   0xb   : > { %p539_p7 = por %p49_p5, %p48_p4  ;;  %s334_s20 = sshll.u32 %s479_s10, 7 }
   0xc   : > { %s545_s18 = scalar_select %p33_p6, %s471_s8, %s35_s14  }
   0xd   : > { %s327_s21 = sshll.u32 %s100_s19, 3  ;;  %s552_s24 = scalar_lea.hbm %s627_s0, %s334_s20 }
   0xe   : > { %s104_s25 = scalar_lea.vmem [#allocation2], %s327_s21  ;;  %p556_p9 = pnand %p343_p8, %p532_p3 }
   0xf   : > { %s114_s26 = sshll.u32 %s104_s25, 4  ;;  %s101_s28 = scalar_lea.sflag [#allocation3], %s100_s19  ;;  %s560_s26 = int_to_ptr.vmem [resolvable:$true] %s114_s26 }
  0x10   : > { %s403_s29 = scalar_lea.hbm %s552_s24, 128  ;;  %p405_p13 = pneg %p556_p9 }
  0x11   : > { %p404_p12 = scmp.ne.s32.totalorder %s552_s24, %s403_s29  ;;  %s408_s3 = scalar_lea.hbm %s627_s0, 256 }
  0x12   : > { %p409_p2 = scmp.lt.u32.totalorder %s552_s24, %s627_s0  ;;  %p410_p3 = scmp.lt.u32.totalorder %s408_s3, %s403_s29 }
  0x13   : > { %p406_p0 = pnand %p405_p13, %p404_p12  ;;  %p412_p5 = scmp.lt.u32.totalorder %s403_s29, %s552_s24 }
  0x14   : > { %p411_p4 = por %p410_p3, %p409_p2 }
  0x15   : > { %p407_p1 = pneg %p406_p0 }
  0x16   : > { %p413_p6 = por %p412_p5, %p411_p4 }
  0x18   : > { %p414_p8 = pnand %p413_p6, %p407_p1 }
  0x1a   : > { %417 = shalt.err (!%p414_p8)
}
  0x1b   : > { %s418_s6 = scalar_lea.vmem %s560_s26, 128  ;;  %s485_s12 = smov [#allocation2]  }
  0x1c   : > { %p419_p12 = scmp.ne.s32.totalorder %s560_s26, %s418_s6  ;;  %s423_s14 = sshll.u32 %s485_s12, 4  ;;  %s424_s14 = int_to_ptr.vmem [resolvable:$false] %s423_s14 }
  0x1d   : > { %s425_s15 = scalar_lea.vmem %s424_s14, 256  ;;  %p426_p11 = scmp.lt.s32.totalorder %s560_s26, %s424_s14 }
  0x1e   : > { %p421_p0 = pnand %p419_p12, %p405_p13  ;;  %p427_p2 = scmp.lt.s32.totalorder %s425_s15, %s418_s6 }
  0x20   : > { %p422_p10 = pneg %p421_p0  ;;  %p428_p3 = por %p427_p2, %p426_p11 }
  0x22   : > { %p429_p4 = pnand %p428_p3, %p422_p10 }
  0x24   : > { %432 = shalt.err (!%p429_p4)
}
  0x25   : > { %342 = dma.hbm_to_vmem [thread:$0]  (!%p556_p9), %s552_s24, 128, %s560_s26, %s101_s28  }
  0x26   : > { %p632_p1 = scmp.lt.s32.totalorder %s483_s11, 3  ;;  %p633_p5 = scmp.ge.s32.totalorder %s483_s11, 1 }
  0x28   : > { %p120_p13 = pnand %p633_p5, %p632_p1 }
  0x29   : > { %s125_s16 = sand.u32 (!%p120_p13), 1, %s467_s7  }
  0x2a   : > { %123 = sbr.rel (%p120_p13) target bundleno = 323 (0x143), region = 24  ;;  %s331_s19 = sshll.u32 (!%p120_p13), %s125_s16, 3 }
  0x2b   : > { %s126_s20 = scalar_lea.sflag (!%p120_p13), [#allocation3], %s125_s16  ;;  %s129_s21 = scalar_lea.vmem (!%p120_p13), [#allocation2], %s331_s19 }
  0x31   : > { %458 = dma.done.wait (%p539_p7), %s126_s20, 128  }
  0x32   : > { %460 = vsyncadd (%p539_p7), %s126_s20, 4294967168  ;;  %vm160_vm0 = vcmask 1043456   ;;  %v156_v0 = vld [vmem:[%s129_s21] sm:$0xff]  ;;  %vm227_vm1 = vcmask 1040384   ;;  %p150_p7 = scmp.lt.s32.totalorder %s475_s9, 1  ;;  %vm241_vm2 = vcmask 0  }
  0x33   : > { %v158_v1 = vcombine.high %v156_v0, %v156_v0  ;;  %v161_v2 = vsel %vm160_vm0, %v156_v0, -inf }
  0x34   : > { %v162_v3 = vrot.slane %v161_v2, 4  ;;  %s642_s9 = smov (!%p150_p7, %s475_s9), 1 }
  0x35   : > { %v168_v4 = vsel %vm160_vm0, %v158_v1, -inf  ;;  %s155_s23 = scalar_lea.vmem %s628_s1, %s642_s9 }
  0x36   : > { %v163_v5 = vmax.f32 %v161_v2, %v162_v3  ;;  %v169_v6 = vrot.slane %v168_v4, 4 }
  0x38   : > { %v164_v7 = vrot.slane %v163_v5, 2  ;;  %v170_v8 = vmax.f32 %v168_v4, %v169_v6 }
  0x3a   : > { %v165_v9 = vmax.f32 %v163_v5, %v164_v7  ;;  %v171_v10 = vrot.slane %v170_v8, 2 }
  0x3c   : > { %v166_v11 = vrot.slane %v165_v9, 1  ;;  %v172_v12 = vmax.f32 %v170_v8, %v171_v10 }
  0x3e   : > { %v167_v13 = vmax.f32 %v165_v9, %v166_v11  ;;  %v173_v14 = vrot.slane %v172_v12, 1 }
  0x40   : > { %v174_v15 = vmax.f32 %v172_v12, %v173_v14 }
  0x42   : > { %v177_v16 = vcombine.low %v167_v13, %v174_v15 }
  0x44   : > { %v179_v17 = vsub.f32 %v156_v0, %v177_v16 }
  0x46   : > { %v180_v18 = vmul.f32 1.442695, %v179_v17 }
  0x48   : > { %393 = vpow2.f32 %v180_v18 }
  0x52   : > { %v394_v19 = vpop.eup %393 }
  0x53   : > { %v199_v20 = vmul.f32 %v394_v19, %v179_v17  ;;  %v183_v21 = vcombine.high %v394_v19, %v394_v19  ;;  %v185_v22 = vsel %vm160_vm0, %v394_v19, 0.0 }
  0x54   : > { %v186_v23 = vrot.slane %v185_v22, 4 }
  0x55   : > { %v201_v24 = vcombine.high %v199_v20, %v199_v20  ;;  %v192_v25 = vsel %vm160_vm0, %v183_v21, 0.0  ;;  %v203_v26 = vsel %vm160_vm0, %v199_v20, 0.0 }
  0x56   : > { %v187_v27 = vadd.f32 %v186_v23, %v185_v22  ;;  %v193_v28 = vrot.slane %v192_v25, 4  ;;  %v204_v29 = vrot.slane %v203_v26, 4 }
  0x57   : > { %v210_v30 = vsel %vm160_vm0, %v201_v24, 0.0 }
  0x58   : > { %v188_v31 = vrot.slane %v187_v27, 2  ;;  %v194_v32 = vadd.f32 %v193_v28, %v192_v25  ;;  %v205_v33 = vadd.f32 %v204_v29, %v203_v26  ;;  %v211_v34 = vrot.slane %v210_v30, 4 }
  0x5a   : > { %v189_v35 = vadd.f32 %v188_v31, %v187_v27  ;;  %v195_v36 = vrot.slane %v194_v32, 2  ;;  %v212_v37 = vadd.f32 %v211_v34, %v210_v30  ;;  %v206_v38 = vrot.slane %v205_v33, 2 }
  0x5c   : > { %v190_v39 = vrot.slane %v189_v35, 1  ;;  %v196_v40 = vadd.f32 %v195_v36, %v194_v32  ;;  %v213_v41 = vrot.slane %v212_v37, 2  ;;  %v207_v44 = vadd.f32 %v206_v38, %v205_v33 }
  0x5e   : > { %v191_v42 = vadd.f32 %v190_v39, %v189_v35  ;;  %v197_v43 = vrot.slane %v196_v40, 1  ;;  %v214_v46 = vadd.f32 %v213_v41, %v212_v37  ;;  %v208_v47 = vrot.slane %v207_v44, 1 }
  0x60   : > { %v198_v45 = vadd.f32 %v197_v43, %v196_v40  ;;  %395 = vrcp.f32 %v191_v42  ;;  %v215_v48 = vrot.slane %v214_v46, 1  ;;  %v209_v49 = vadd.f32 %v208_v47, %v207_v44 }
  0x61   : > { %397 = vlog2.f32 %v191_v42 }
  0x62   : > { %399 = vrcp.f32 %v198_v45  ;;  %v216_v50 = vadd.f32 %v215_v48, %v214_v46 }
  0x63   : > { %401 = vlog2.f32 %v198_v45 }
  0x6a   : > { %v396_v51 = vpop.eup %395 }
  0x6b   : > { %v398_v52 = vpop.eup %397  ;;  %v218_v53 = vmul.f32 %v396_v51, %v209_v49 }
  0x6c   : > { %v400_v54 = vpop.eup %399  ;;  %v222_v55 = vmul.f32 0.6931472, %v398_v52 }
  0x6d   : > { %v402_v56 = vpop.eup %401  ;;  %v220_v57 = vmul.f32 %v400_v54, %v216_v50 }
  0x6e   : > { %v224_v58 = vmul.f32 0.6931472, %v402_v56  ;;  %v225_v59 = vsub.f32 %v218_v53, %v222_v55 }
  0x70   : > { %v226_v60 = vsub.f32 %v220_v57, %v224_v58  ;;  %v228_v61 = vsel %vm227_vm1, %v225_v59, 0.0 }
  0x72   : > { %v229_v62 = vsel %vm227_vm1, %v226_v60, 0.0 }
  0x73   : > { %v230_v63 = vadd.f32 %v229_v62, %v228_v61 }
  0x75   : > { %231 = vadd.xlane.f32.xlu0 %v230_v63 }
 0x102   : > { %v232_v0 = vpop.xlane.xlu0 %231 }
 0x103   : > { %v233_v1 = vrot.slane %v232_v0, 4 }
 0x105   : > { %v234_v2 = vadd.f32 %v233_v1, %v232_v0 }
 0x107   : > { %v235_v3 = vrot.slane %v234_v2, 2 }
 0x109   : > { %v236_v4 = vadd.f32 %v235_v3, %v234_v2 }
 0x10b   : > { %v237_v5 = vrot.slane %v236_v4, 1 }
 0x10d   : > { %v238_v6 = vadd.f32 %v237_v5, %v236_v4 }
 0x10f   : > { %335 = vpush %v238_v6 }
 0x140   : > { %s336_s24 = spop %335 }
 0x141   : > { %v240_v7 = vstv %s336_s24 }
 0x142   : > { %242 = vst.msk [vmem:[%s155_s23] sm:$0x1] %vm241_vm2, %v240_v7 }
 0x143 PF: > { %s14_s11 = sadd.s32 1, %s483_s11   ;;  %s634_s6 = smov %s467_s7 }
 0x144   : > { %p11_p9 = scmp.ge.s32.totalorder %s14_s11, 4   ;;  %s635_s7 = smov %s471_s8 }
 0x145   : > { %s636_s8 = smov %s545_s18  ;;  %s637_s9 = smov %s479_s10 }
 0x146   : > { %s638_s10 = smov %s640_s13  ;;  %13 = sbr.rel (!%p11_p9) target bundleno = 4 (0x4), region = 64 }
 0x14d   :  { %266 = vsyncpa [#allocation3], 1 }
 0x14e   :  { %268 = vsyncpa [#allocation3 + $0x1], 1 }

</bundles_post_ra>
